<compile_context>
chip_gen: v6e
topology: v6e:2x2x1
jax: 0.10.0
libtpu: 0.0.40
codegen_flags: <defaults>
</compile_context>

<pallas_src>
from functools import partial

import jax
import jax.numpy as jnp
from jax.experimental import pallas as pl
from jax.experimental.pallas import tpu as pltpu


def _vmem_capacity_bytes():
    try:
        return int(pltpu.get_tpu_info().vmem_capacity_bytes)
    except Exception:
        return 64 * 1024 * 1024  # conservative default (v7x per-TC VMEM)


# --------------------------------------------------------------------------- #
# Single-pass path: whole (Bn, C, HW) slab resident per grid step.
# --------------------------------------------------------------------------- #
def _scse_fused_kernel(x_ref, wf_t_ref, ws_ref, o_ref, *, inv_hw):
    x = x_ref[...]                                   # (Bn, C, HW), I/O dtype
    xf = x.astype(jnp.float32)                       # f32 only for the reductions

    # cSE: channel means -> folded squeeze/excitation matmul -> sigmoid.
    mean = jnp.sum(xf, axis=-1) * inv_hw             # (Bn, C) f32
    z = jax.nn.sigmoid(
        jnp.dot(mean, wf_t_ref[...], preferred_element_type=jnp.float32))  # (Bn, C)

    # sSE: 1x1 conv C->1 as VPU multiply + cross-sublane reduce (MXU-free).
    q = jax.nn.sigmoid(
        jnp.sum(xf * ws_ref[...][None, :, :], axis=1, keepdims=True))      # (Bn, 1, HW)

    # Apply in the I/O dtype: U * (z + q) == cSE(U) + sSE(U).
    scale = z[:, :, None].astype(x.dtype) + q.astype(x.dtype)              # (Bn, C, HW)
    o_ref[...] = (x * scale).astype(o_ref.dtype)


# --------------------------------------------------------------------------- #
# Two-phase HW-tiled fallback (slab does not fit VMEM, e.g. v7x 64 MiB).
# --------------------------------------------------------------------------- #
def _chan_sum_kernel(x_ref, o_ref, *, hw_true, thw):
    # grid = (N, HW tiles); o block (1, C, 1) stays resident across the HW axis.
    j = pl.program_id(1)

    @pl.when(j == 0)
    def _():
        o_ref[...] = jnp.zeros_like(o_ref)

    x = x_ref[0].astype(jnp.float32)                             # (C, thw)
    col = jax.lax.broadcasted_iota(jnp.int32, x.shape, 1) + j * thw
    x = jnp.where(col < hw_true, x, 0.0)                         # mask OOB tail columns
    o_ref[0] += jnp.sum(x, axis=-1, keepdims=True)               # (C, 1)


def _scse_apply_kernel(x_ref, z_ref, ws_ref, o_ref):
    x = x_ref[0]                                                 # (C, thw), I/O dtype
    xf = x.astype(jnp.float32)
    q = jax.nn.sigmoid(
        jnp.sum(xf * ws_ref[...], axis=0, keepdims=True))        # (1, thw)
    scale = z_ref[0].astype(x.dtype) + q.astype(x.dtype)         # (C, thw)
    o_ref[0] = (x * scale).astype(o_ref.dtype)                   # OOB tail writes masked


# --------------------------------------------------------------------------- #
# Wrapper
# --------------------------------------------------------------------------- #
def scse_forward(u_nchw, w_sq, w_ex, w_s, *, donate_input=False,
                 force_tiled=False, tile_hw=None):
    """u_nchw: (N, C, H, W) float (f32 / bf16).  1x1-conv weights (no bias):
       w_sq: (C//2, C), w_ex: (C, C//2), w_s: (1, C).
       Returns (N, C, H, W) in the input dtype."""
    n, c, h, w = u_nchw.shape
    hw = h * w
    dtype = u_nchw.dtype
    s = jnp.dtype(dtype).itemsize

    x = u_nchw.reshape(n, c, hw)          # metadata-only; no extra HBM pass

    # Fold the two 1x1 convs (no nonlinearity between them in this module) into a
    # single matrix, stored transposed so the kernel computes mean @ w_fold_t.
    w_fold_t = jnp.dot(w_sq.astype(jnp.float32).T,
                       w_ex.astype(jnp.float32).T)               # (C, C)
    w_s_col = w_s.astype(jnp.float32).reshape(c, 1)              # (C, 1)

    cap = _vmem_capacity_bytes()
    budget = int(cap * 0.8)                                      # generation-aware clamp

    # Per-element VMEM cost of one grid step: 2x in + 2x out buffers (I/O dtype),
    # f32 reduction temporaries, and the I/O-dtype scale temp.
    bytes_per_elem = 5 * s + 8
    weights_bytes = (c * c + c) * 4 * 2
    margin = 2 << 20

    per_batch = c * hw
    per_batch_bytes = per_batch * s

    def fused_need(bn):
        return bn * per_batch * bytes_per_elem + weights_bytes + margin

    if not force_tiled and fused_need(1) <= budget:
        # ---------------- single-pass, batch-blocked path ----------------
        bn_target = max(1, (2 << 20) // max(1, per_batch_bytes))  # ~2 MiB / input buf
        if n >= 2:
            bn_target = min(bn_target, max(1, n // 2))            # >=2 steps (v7x cores)
        bn_target = min(bn_target, n)
        bn = 1
        for d in range(bn_target, 0, -1):                         # divisor of N: no
            if n % d == 0 and fused_need(d) <= budget:            # partial batch blocks
                bn = d
                break
        grid_n = n // bn

        cost = pl.CostEstimate(
            flops=int(n * (5 * c * hw + 2 * c * c)),
            transcendentals=int(n * (c + hw)),
            bytes_accessed=int(2 * n * c * hw * s + (c * c + c) * 4),
        )
        out = pl.pallas_call(
            partial(_scse_fused_kernel, inv_hw=1.0 / hw),
            out_shape=jax.ShapeDtypeStruct((n, c, hw), dtype),
            grid_spec=pltpu.PrefetchScalarGridSpec(
                num_scalar_prefetch=0,
                grid=(grid_n,),
                in_specs=[
                    pl.BlockSpec((bn, c, hw), lambda i: (i, 0, 0)),
                    pl.BlockSpec((c, c), lambda i: (0, 0)),
                    pl.BlockSpec((c, 1), lambda i: (0, 0)),
                ],
                out_specs=pl.BlockSpec((bn, c, hw), lambda i: (i, 0, 0)),
            ),
            compiler_params=pltpu.CompilerParams(
                dimension_semantics=("parallel",),
                vmem_limit_bytes=int(min(max(fused_need(bn), 32 << 20), budget)),
            ),
            cost_estimate=cost,
            input_output_aliases={0: 0} if donate_input else {},
        )(x, w_fold_t, w_s_col)
        return out.reshape(n, c, h, w)

    # ---------------- two-phase HW-tiled fallback ----------------
    if tile_hw is not None:
        thw = max(128, (int(tile_hw) // 128) * 128)
    else:
        thw = max(128, ((4 << 20) // max(1, c * bytes_per_elem)) // 128 * 128)
    hw_ceil = -(-hw // 128) * 128
    thw = min(thw, hw_ceil)
    while thw > 128 and c * thw * bytes_per_elem + weights_bytes + margin > budget:
        thw -= 128
    nt = -(-hw // thw)
    vmem_limit = int(min(max(c * thw * bytes_per_elem + weights_bytes + margin,
                             32 << 20), budget))

    # Phase 1: per-(batch, channel) sums accumulated across HW tiles.
    sums = pl.pallas_call(
        partial(_chan_sum_kernel, hw_true=hw, thw=thw),
        out_shape=jax.ShapeDtypeStruct((n, c, 1), jnp.float32),
        grid_spec=pltpu.PrefetchScalarGridSpec(
            num_scalar_prefetch=0,
            grid=(n, nt),
            in_specs=[pl.BlockSpec((1, c, thw), lambda i, j: (i, 0, j))],
            out_specs=pl.BlockSpec((1, c, 1), lambda i, j: (i, 0, 0)),
        ),
        compiler_params=pltpu.CompilerParams(
            dimension_semantics=("parallel", "arbitrary"),
            vmem_limit_bytes=vmem_limit,
        ),
    )(x)

    # Tiny (N, C) matmul + sigmoid in plain JAX (negligible HBM traffic).
    z = jax.nn.sigmoid(jnp.dot(sums[:, :, 0] * (1.0 / hw), w_fold_t))  # (N, C)
    z = z[:, :, None]                                                  # (N, C, 1)

    # Phase 2: apply U * (z + sigmoid(w_s . U)) tile by tile (both axes parallel).
    out = pl.pallas_call(
        _scse_apply_kernel,
        out_shape=jax.ShapeDtypeStruct((n, c, hw), dtype),
        grid_spec=pltpu.PrefetchScalarGridSpec(
            num_scalar_prefetch=0,
            grid=(n, nt),
            in_specs=[
                pl.BlockSpec((1, c, thw), lambda i, j: (i, 0, j)),
                pl.BlockSpec((1, c, 1), lambda i, j: (i, 0, 0)),
                pl.BlockSpec((c, 1), lambda i, j: (0, 0)),
            ],
            out_specs=pl.BlockSpec((1, c, thw), lambda i, j: (i, 0, j)),
        ),
        compiler_params=pltpu.CompilerParams(
            dimension_semantics=("parallel", "parallel"),
            vmem_limit_bytes=vmem_limit,
        ),
        input_output_aliases={0: 0} if donate_input else {},
    )(x, z, w_s_col)
    return out.reshape(n, c, h, w)


def scse_reference(u, w_sq, w_ex, w_s):
    """Pure-JAX reference mirroring the PyTorch module (unfolded weights)."""
    z = jnp.mean(u.astype(jnp.float32), axis=(2, 3))    # (N, C)
    z = jnp.einsum('oc,nc->no', w_sq, z)                # (N, C//2)
    z = jnp.einsum('oc,nc->no', w_ex, z)                # (N, C)
    z = jax.nn.sigmoid(z)[:, :, None, None]             # (N, C, 1, 1)
    u_f32 = u.astype(jnp.float32)
    u_cse = u_f32 * z
    q = jnp.einsum('oc,nchw->nohw', w_s, u_f32)         # (N, 1, H, W)
    q = jax.nn.sigmoid(q)
    u_sse = u_f32 * q
    return u_cse + u_sse


if __name__ == "__main__":
    key = jax.random.PRNGKey(0)
    k_u, k_sq, k_ex, k_s, k_u2 = jax.random.split(key, 5)

    N, C, H, W = 2, 8, 16, 16       # C must be even (C//2 squeeze)
    U = jax.random.normal(k_u, (N, C, H, W), dtype=jnp.float32)
    w_sq = jax.random.normal(k_sq, (C // 2, C), dtype=jnp.float32) * 0.2
    w_ex = jax.random.normal(k_ex, (C, C // 2), dtype=jnp.float32) * 0.2
    w_s = jax.random.normal(k_s, (1, C), dtype=jnp.float32) * 0.2

    # Case 1: f32, HW multiple of 128 (16*16 = 256)
    out = jax.block_until_ready(scse_forward(U, w_sq, w_ex, w_s))
    ref = scse_reference(U, w_sq, w_ex, w_s)
    assert out.shape == (N, C, H, W)
    assert out.dtype == U.dtype
    assert jnp.allclose(out, ref, atol=1e-4, rtol=1e-4), "f32 mismatch vs reference"

    # Case 2: f32, non-multiple-of-128 spatial (14*14 = 196), no pad/slice passes
    U2 = jax.random.normal(k_u2, (N, C, 14, 14), dtype=jnp.float32)
    out2 = jax.block_until_ready(scse_forward(U2, w_sq, w_ex, w_s))
    ref2 = scse_reference(U2, w_sq, w_ex, w_s)
    assert jnp.allclose(out2, ref2, atol=1e-4, rtol=1e-4), "unpadded-HW mismatch vs reference"

    # Case 3: bf16 I/O (f32 accumulation for reductions, bf16 apply)
    U_bf = U.astype(jnp.bfloat16)
    out_bf = jax.block_until_ready(scse_forward(U_bf, w_sq, w_ex, w_s))
    assert out_bf.dtype == jnp.bfloat16
    ref_bf = scse_reference(U_bf.astype(jnp.float32), w_sq, w_ex, w_s)
    assert jnp.allclose(out_bf.astype(jnp.float32), ref_bf, atol=5e-2, rtol=5e-2), \
        "bf16 mismatch vs reference"

    # Case 4: force the two-phase HW-tiled fallback (partial last HW tile exercised)
    out_t = jax.block_until_ready(
        scse_forward(U2, w_sq, w_ex, w_s, force_tiled=True, tile_hw=128))
    assert jnp.allclose(out_t, ref2, atol=1e-4, rtol=1e-4), "tiled-path mismatch vs reference"

    print("KERNEL_OK")
</pallas_src>

<mosaic_0001>
module attributes {stable_mosaic.version = 11 : i64} {
  func.func @_scse_fused_kernel(%arg0: i32, %arg1: memref<1x8x256xf32, #tpu.memory_space<vmem>>, %arg2: memref<8x8xf32, #tpu.memory_space<vmem>>, %arg3: memref<8x1xf32, #tpu.memory_space<vmem>>, %arg4: memref<1x8x256xf32, #tpu.memory_space<vmem>>) attributes {dimension_semantics = [#tpu.dimension_semantics<parallel>], iteration_bounds = array<i64: 2>, scalar_prefetch = 0 : i64, scratch_operands = 0 : i64, tpu.core_type = #tpu.core_type<tc>, window_params = [{transform_indices = @transform_0, window_bounds = array<i64: 1, 8, 256>}, {pipeline_mode = #tpu.pipeline_mode<synchronous>, transform_indices = @transform_1, window_bounds = array<i64: 8, 8>}, {pipeline_mode = #tpu.pipeline_mode<synchronous>, transform_indices = @transform_2, window_bounds = array<i64: 8, 1>}, {transform_indices = @transform_3, window_bounds = array<i64: 1, 8, 256>}]} {
    %c0 = arith.constant 0 : index
    %c0_0 = arith.constant 0 : index
    %c0_1 = arith.constant 0 : index
    %0 = vector.load %arg1[%c0, %c0_0, %c0_1] : memref<1x8x256xf32, #tpu.memory_space<vmem>>, vector<1x8x256xf32>
    %cst = arith.constant dense<0.000000e+00> : vector<1x8xf32>
    %1 = vector.multi_reduction <add>, %0, %cst [2] : vector<1x8x256xf32> to vector<1x8xf32>
    %cst_2 = arith.constant 3.906250e-03 : f32
    %2 = vector.broadcast %cst_2 : f32 to vector<1x8xf32>
    %3 = arith.mulf %1, %2 : vector<1x8xf32>
    %c0_3 = arith.constant 0 : index
    %c0_4 = arith.constant 0 : index
    %4 = vector.load %arg2[%c0_3, %c0_4] : memref<8x8xf32, #tpu.memory_space<vmem>>, vector<8x8xf32>
    %cst_5 = arith.constant dense<0.000000e+00> : vector<1x8xf32>
    %5 = tpu.matmul %3, %4, %cst_5 {dimension_numbers = #tpu.dot_dimension_numbers<[1], [0], [0], [1], [0, 0, 1, 1], [], []>} : vector<1x8xf32>, vector<8x8xf32>, vector<1x8xf32> -> vector<1x8xf32>
    %6 = arith.negf %5 : vector<1x8xf32>
    %7 = math.exp %6 : vector<1x8xf32>
    %cst_6 = arith.constant 1.000000e+00 : f32
    %8 = vector.broadcast %cst_6 : f32 to vector<1x8xf32>
    %9 = arith.addf %8, %7 : vector<1x8xf32>
    %10 = arith.divf %8, %9 : vector<1x8xf32>
    %c0_7 = arith.constant 0 : index
    %c0_8 = arith.constant 0 : index
    %11 = vector.load %arg3[%c0_7, %c0_8] : memref<8x1xf32, #tpu.memory_space<vmem>>, vector<8x1xf32>
    %12 = vector.shape_cast %11 : vector<8x1xf32> to vector<1x8x1xf32>
    %13 = vector.broadcast %12 : vector<1x8x1xf32> to vector<1x8x256xf32>
    %14 = arith.mulf %0, %13 : vector<1x8x256xf32>
    %cst_9 = arith.constant dense<0.000000e+00> : vector<1x256xf32>
    %15 = vector.multi_reduction <add>, %14, %cst_9 [1] : vector<1x8x256xf32> to vector<1x256xf32>
    %16 = vector.shape_cast %15 : vector<1x256xf32> to vector<1x1x256xf32>
    %17 = arith.negf %16 : vector<1x1x256xf32>
    %18 = math.exp %17 : vector<1x1x256xf32>
    %cst_10 = arith.constant 1.000000e+00 : f32
    %19 = vector.broadcast %cst_10 : f32 to vector<1x1x256xf32>
    %20 = arith.addf %19, %18 : vector<1x1x256xf32>
    %21 = arith.divf %19, %20 : vector<1x1x256xf32>
    %22 = vector.shape_cast %10 : vector<1x8xf32> to vector<1x8x1xf32>
    %23 = vector.broadcast %22 : vector<1x8x1xf32> to vector<1x8x256xf32>
    %24 = vector.broadcast %21 : vector<1x1x256xf32> to vector<1x8x256xf32>
    %25 = arith.addf %23, %24 : vector<1x8x256xf32>
    %26 = arith.mulf %0, %25 : vector<1x8x256xf32>
    %c0_11 = arith.constant 0 : index
    %c0_12 = arith.constant 0 : index
    %c0_13 = arith.constant 0 : index
    %27 = vector.load %arg4[%c0_11, %c0_12, %c0_13] : memref<1x8x256xf32, #tpu.memory_space<vmem>>, vector<1x8x256xf32>
    tpu.vector_store %arg4[%c0_11, %c0_12, %c0_13], %26 {strides = array<i32>} : memref<1x8x256xf32, #tpu.memory_space<vmem>>, vector<1x8x256xf32>,
    return
  }
  func.func @transform_0(%arg0: i32) -> (i32, i32, i32) {
    %c0_i32 = arith.constant 0 : i32
    %c0_i32_0 = arith.constant 0 : i32
    %c0_i32_1 = arith.constant 0 : i32
    return %arg0, %c0_i32, %c0_i32_0 : i32, i32, i32
  }
  func.func @transform_1(%arg0: i32) -> (i32, i32) {
    %c0_i32 = arith.constant 0 : i32
    %c0_i32_0 = arith.constant 0 : i32
    %c0_i32_1 = arith.constant 0 : i32
    return %c0_i32, %c0_i32_0 : i32, i32
  }
  func.func @transform_2(%arg0: i32) -> (i32, i32) {
    %c0_i32 = arith.constant 0 : i32
    %c0_i32_0 = arith.constant 0 : i32
    %c0_i32_1 = arith.constant 0 : i32
    return %c0_i32, %c0_i32_0 : i32, i32
  }
  func.func @transform_3(%arg0: i32) -> (i32, i32, i32) {
    %c0_i32 = arith.constant 0 : i32
    %c0_i32_0 = arith.constant 0 : i32
    %c0_i32_1 = arith.constant 0 : i32
    return %arg0, %c0_i32, %c0_i32_0 : i32, i32, i32
  }
}

</mosaic_0001>

<bundles_post_ra>
// kernel: tpu_custom_call.1
= control target key start
LH: loop header
LB: loop body
LE: loop exit
PB: predicated region body
PF: predicated region fallthrough
CT: control target
= control target key end

     0   :  { %8 = vsyncpa [#allocation3], 0  ;;  %s785_s0 = inlined_call_operand.hbm [shape: f32[2,8,256], index: 0, kind: input, shape index: {}]   ;;  %s786_s1 = inlined_call_operand.vmem [shape: f32[8,8], index: 1, kind: input, shape index: {}]   ;;  %s787_s2 = inlined_call_operand.vmem [shape: f32[8,1], index: 2, kind: input, shape index: {}]   ;;  %s788_s3 = inlined_call_operand.hbm [shape: f32[2,8,256], index: 3, kind: output, shape index: {}]  }
   0x1   :  { %10 = vsyncpa [#allocation3 + $0x1], 0 }
   0x2   :  { %11 = vsyncpa [#allocation4], 0 }
   0x3   :  { %13 = vsyncpa [#allocation4 + $0x1], 0  ;;  %s618_s12 = smov 0   ;;  %s620_s13 = smov 0  }
   0x4   :  { %s622_s14 = smov 0   ;;  %s624_s15 = smov 0  }
   0x5 LB: > { %s639_s16 = sadd.s32 4294967295, %s591_s15   ;;  %s410_s17 = sadd.s32 4294967294, %s591_s15   ;;  %s591_s15 = sphi %s624_s15, %s805_s15   ;;  %s587_s14 = sphi %s622_s14, %s804_s14   ;;  %s583_s13 = sphi %s620_s13, %s803_s13   ;;  %s579_s12 = sphi %s618_s12, %s802_s12  }
   0x6   : > { %s643_s18 = sadd.s32 1, %s591_s15   ;;  %s26_s19 = sadd.s32 1, %s587_s14 }
   0x7   : > { %s23_s20 = ssub.s32 %s591_s15, %s643_s18  ;;  %p33_p0 = scmp.ne.s32.totalorder %s587_s14, %s583_s13 }
   0x8   : > { %p24_p1 = scmp.eq.s32.totalorder %s23_s20, 0  ;;  %p34_p2 = scmp.eq.s32.totalorder %s591_s15, 0 }
   0x9   : > { %p39_p3 = scmp.ne.s32.totalorder %s583_s13, %s579_s12  ;;  %p40_p4 = scmp.eq.s32.totalorder %s639_s16, 0 }
   0xa   : > { %s655_s21 = scalar_select %p24_p1, %s587_s14, %s26_s19  }
   0xb   : > { %p657_p5 = por %p34_p2, %p33_p0  ;;  %p661_p6 = por %p40_p4, %p39_p3 }
   0xc   : > { %p105_p7 = scmp.eq.s32.totalorder %s639_s16, 1  ;;  %p111_p8 = scmp.eq.s32.totalorder %s410_s17, 1 }
   0xd   : > { %s792_s23 = scalar_select %p661_p6, 1, 0 }
   0xe   : > { %p449_p10 = scmp.lt.s32.totalorder %s591_s15, 2  ;;  %p668_p11 = por %p105_p7, %p33_p0 }
   0xf   : > { %p672_p12 = por %p111_p8, %p39_p3  ;;  %s137_s26 = sand.u32 1, %s587_s14  }
  0x10   : > { %s793_s24 = scalar_select %p668_p11, 1, 0 }
  0x11   : > { %s794_s25 = scalar_select %p672_p12, 1, 0 }
  0x12   : > { %s428_s27 = sshll.u32 %s591_s15, 8  ;;  %s413_s28 = sshll.u32 %s137_s26, 4 }
  0x13   : > { %s681_s4 = scalar_lea.hbm %s785_s0, %s428_s27  ;;  %s141_s5 = scalar_lea.vmem [#allocation2], %s413_s28 }
  0x14   : > { %s149_s6 = sshll.u32 %s141_s5, 4  ;;  %p685_p13 = pnand %p449_p10, %p657_p5  ;;  %s689_s6 = int_to_ptr.vmem [resolvable:$true] %s149_s6 }
  0x15   : > { %s138_s8 = scalar_lea.sflag [#allocation3], %s137_s26  ;;  %s499_s9 = scalar_lea.hbm %s681_s4, 256 }
  0x16   : > { %p500_p2 = scmp.ne.s32.totalorder %s681_s4, %s499_s9  ;;  %p501_p3 = pneg %p685_p13 }
  0x17   : > { %s504_s17 = scalar_lea.hbm %s785_s0, 512  ;;  %p505_p5 = scmp.lt.s32.totalorder %s681_s4, %s785_s0 }
  0x18   : > { %p502_p4 = pnand %p501_p3, %p500_p2  ;;  %p506_p8 = scmp.lt.s32.totalorder %s504_s17, %s499_s9 }
  0x1a   : > { %p503_p7 = pneg %p502_p4  ;;  %p507_p10 = por %p506_p8, %p505_p5 }
  0x1c   : > { %p508_p9 = pnand %p507_p10, %p503_p7 }
  0x1e   : > { %511 = shalt.err (!%p508_p9)
}
  0x1f   : > { %s512_s22 = scalar_lea.vmem %s689_s6, 256  ;;  %s593_s26 = smov [#allocation2]  }
  0x20   : > { %p513_p0 = scmp.ne.s32.totalorder %s689_s6, %s512_s22  ;;  %s517_s27 = sshll.u32 %s593_s26, 4  ;;  %s518_s27 = int_to_ptr.vmem [resolvable:$false] %s517_s27 }
  0x21   : > { %s519_s28 = scalar_lea.vmem %s518_s27, 512  ;;  %p520_p4 = scmp.lt.s32.totalorder %s689_s6, %s518_s27 }
  0x22   : > { %p515_p1 = pnand %p513_p0, %p501_p3  ;;  %p521_p12 = scmp.lt.s32.totalorder %s519_s28, %s512_s22 }
  0x24   : > { %p516_p2 = pneg %p515_p1  ;;  %p522_p11 = por %p521_p12, %p520_p4 }
  0x26   : > { %p523_p6 = pnand %p522_p11, %p516_p2 }
  0x28   : > { %526 = shalt.err (!%p523_p6)
}
  0x29   : > { %444 = dma.hbm_to_vmem [thread:$0]  (!%p685_p13), %s681_s4, 256, %s689_s6, %s138_s8  }
  0x2a   : > { %p796_p9 = scmp.lt.s32.totalorder %s591_s15, 3  ;;  %p797_p7 = scmp.ge.s32.totalorder %s591_s15, 1 }
  0x2c   : > { %p155_p0 = pnand %p797_p7, %p796_p9 }
  0x2d   : > { %s716_s29 = sand.u32 (!%p155_p0), 1, %s583_s13   ;;  %p798_p6 = scmp.ne.s32.totalorder (!%p155_p0), %s792_s23, 0 }
  0x2e   : > { %158 = sbr.rel (%p155_p0) target bundleno = 556 (0x22c), region = 32  ;;  %s417_s30 = sshll.u32 (!%p155_p0), %s716_s29, 4 }
  0x2f   : > { %s161_s5 = scalar_lea.sflag (!%p155_p0), [#allocation3], %s716_s29  ;;  %s164_s7 = scalar_lea.vmem (!%p155_p0), [#allocation2], %s417_s30 }
  0x33   : > { %570 = dma.done.wait (%p798_p6), %s161_s5, 256  }
  0x34   : > { %572 = vsyncadd (%p798_p6), %s161_s5, 4294967040  ;;  %v726_v0 = vld [vmem:[%s164_s7] sm:$0xff]  ;;  %v728_v1 = vld [vmem:[%s164_s7 + $0x8] sm:$0xff]  ;;  %v594_v3 = vmov 0.0   ;;  %vm595_vm0 = vmmov 0   ;;  %v596_v5 = vmov 0   ;;  %v195_v7 = vlaneseq }
  0x35   : > { %v189_v2 = vadd.f32 %v728_v1, %v726_v0  ;;  %432 = vmatprep.subr.mxu0 %v594_v3  ;;  %v193_v4 = vld [vmem:[%s786_s1] sm:$0xff]  ;;  %434 = vmatprep.mubr.msk.f32.mxu0 %vm595_vm0, %v594_v3  ;;  %vm201_vm1 = vcmask 64512   ;;  %s429_s9 = sshll.u32 %s639_s16, 8  ;;  %s186_s10 = scalar_lea.vmem [#allocation5], %s417_s30 }
  0x36   : > { %433 = vmatpush3.msra.mxu0 %v193_v4  ;;  %486 = vset.pattern.permute.xlu0 %v596_v5  ;;  %v280_v6 = vld [vmem:[%s787_s2] sm:$0xff]  ;;  %v196_v8 = vand.u32 127, %v195_v7  ;;  %v198_v9 = vshrl.u32 %v195_v7, 7  ;;  %s340_s11 = sshll.u32 %s186_s10, 4  ;;  %s748_s20 = scalar_lea.hbm %s788_s3, %s429_s9  ;;  %s341_s11 = int_to_ptr.vmem [resolvable:$true] %s340_s11 }
  0x37   : > { %190 = vadd.xlane.f32.xlu0 %v189_v2  ;;  %s326_s22 = scalar_lea.sflag [#allocation4], %s716_s29  ;;  %s527_s26 = scalar_lea.vmem %s341_s11, 256 }
  0x38   : > { %v199_v10 = vsub.s32 %v196_v8, %v198_v9  ;;  %v314_v19 = vsub.s32 0, %v198_v9  ;;  %p528_p11 = scmp.ne.s32.totalorder %s341_s11, %s527_s26  ;;  %p799_p12 = scmp.ne.s32.totalorder %s793_s24, 0 }
  0x39   : > { %s597_s16 = smov [#allocation5]  }
  0x3a   : > { %p529_p13 = pnand %p528_p11, %p799_p12  ;;  %s531_s27 = sshll.u32 %s597_s16, 4  ;;  %s532_s27 = int_to_ptr.vmem [resolvable:$false] %s531_s27 }
  0x3b   : > { %s533_s28 = scalar_lea.vmem %s532_s27, 512  ;;  %p534_p3 = scmp.lt.s32.totalorder %s341_s11, %s532_s27 }
  0x3c   : > { %p530_p1 = pneg %p529_p13  ;;  %p535_p5 = scmp.lt.s32.totalorder %s533_s28, %s527_s26 }
  0x3e   : > { %p536_p8 = por %p535_p5, %p534_p3 }
  0x40   : > { %p537_p10 = pnand %p536_p8, %p530_p1 }
  0x4d   : > { %283 = vperm.xlu0 %486, %v280_v6  }
  0xc0   : > { %v191_v11 = vpop.xlane.xlu0 %190 }
  0xc1   : > { %v192_v12 = vmul.f32 0.00390625, %v191_v11 }
  0xc3   : > { %v200_v13 = vrot.slane %v192_v12, %v199_v10 }
  0xc5   : > { %435 = vmatmul.mubr.msk.f32.vlgmr.msra.gmra.mxu0 %vm201_vm1, %v200_v13 }
  0xc8   : > { %v284_v22 = vpop.permute.xlu0 %283 }
  0xc9   : > { %v286_v23 = vmul.f32 %v284_v22, %v726_v0  ;;  %v287_v24 = vmul.f32 %v284_v22, %v728_v1 }
  0xcb   : > { %v288_v25 = vrot.slane %v286_v23, 4  ;;  %v294_v26 = vrot.slane %v287_v24, 4 }
  0xcd   : > { %v289_v27 = vadd.f32 %v288_v25, %v286_v23  ;;  %v295_v28 = vadd.f32 %v294_v26, %v287_v24 }
  0xcf   : > { %v290_v29 = vrot.slane %v289_v27, 2  ;;  %v296_v30 = vrot.slane %v295_v28, 2 }
  0xd1   : > { %v291_v31 = vadd.f32 %v290_v29, %v289_v27  ;;  %v297_v32 = vadd.f32 %v296_v30, %v295_v28 }
  0xd3   : > { %v292_v33 = vrot.slane %v291_v31, 1  ;;  %v298_v34 = vrot.slane %v297_v32, 1 }
  0xd5   : > { %v293_v35 = vadd.f32 %v292_v33, %v291_v31  ;;  %v299_v36 = vadd.f32 %v298_v34, %v297_v32 }
  0xd7   : > { %v421_v37 = vmul.f32 -1.442695, %v293_v35  ;;  %v422_v38 = vmul.f32 -1.442695, %v299_v36 }
 0x185   : > { %v270_v14 = vpop.f32.mrf.mxu0 }
 0x186   : > { %v420_v15 = vmul.f32 -1.442695, %v270_v14 }
 0x187   : > { %v436_v16 = vpop.f32.mrf.mxu0 }
 0x188   : > { %487 = vpow2.f32 %v420_v15 }
 0x195   : > { %v488_v17 = vpop.eup %487 }
 0x196   : > { %v277_v18 = vadd.f32 1.0, %v488_v17 }
 0x198   : > { %489 = vrcp.f32 %v277_v18 }
 0x199   : > { %491 = vpow2.f32 %v421_v37 }
 0x19a   : > { %493 = vpow2.f32 %v422_v38 }
 0x1a5   : > { %v490_v20 = vpop.eup %489 }
 0x1a6   : > { %v315_v21 = vrot.slane %v490_v20, %v314_v19  ;;  %v492_v39 = vpop.eup %491 }
 0x1a7   : > { %v494_v40 = vpop.eup %493  ;;  %v306_v41 = vadd.f32 1.0, %v492_v39 }
 0x1a8   : > { %317 = vbcast.lane.b32.xlu1 %v315_v21, 256  ;;  %v307_v42 = vadd.f32 1.0, %v494_v40 }
 0x1a9   : > { %495 = vrcp.f32 %v306_v41 }
 0x1aa   : > { %497 = vrcp.f32 %v307_v42 }
 0x1b6   : > { %v496_v43 = vpop.eup %495 }
 0x1b7   : > { %v498_v44 = vpop.eup %497 }
 0x21a   : > { %v318_v45 = vpop.permute.xlu1 %317 }
 0x21b   : > { %v319_v46 = vadd.f32 %v496_v43, %v318_v45  ;;  %v320_v47 = vadd.f32 %v498_v44, %v318_v45 }
 0x21d   : > { %v321_v48 = vmul.f32 %v319_v46, %v726_v0  ;;  %v322_v49 = vmul.f32 %v320_v47, %v728_v1 }
 0x21f   : > { %323 = vst [vmem:[%s186_s10] sm:$0xff] %v321_v48  ;;  %324 = vst [vmem:[%s186_s10 + $0x8] sm:$0xff] %v322_v49 }
 0x220   : > { %540 = shalt.err (!%p537_p10)
}
 0x221   : > { %s541_s30 = scalar_lea.hbm %s748_s20, 256  ;;  %s545_s7 = scalar_lea.hbm %s788_s3, 512 }
 0x222   : > { %p542_p2 = scmp.ne.s32.totalorder %s748_s20, %s541_s30  ;;  %p546_p7 = scmp.lt.s32.totalorder %s748_s20, %s788_s3 }
 0x223   : > { %p547_p0 = scmp.lt.s32.totalorder %s545_s7, %s541_s30 }
 0x224   : > { %p543_p4 = pnand %p542_p2, %p799_p12 }
 0x225   : > { %p548_p6 = por %p547_p0, %p546_p7 }
 0x226   : > { %p544_p9 = pneg %p543_p4 }
 0x228   : > { %p549_p11 = pnand %p548_p6, %p544_p9 }
 0x22a   : > { %552 = shalt.err (!%p549_p11)
}
 0x22b   : > { %439 = dma.vmem_to_hbm [thread:$0]  (%p799_p12), %s341_s11, 256, %s748_s20, %s326_s22  }
 0x22c PF: > { %s352_s23 = sand.u32 1, %s579_s12   ;;  %p800_p13 = scmp.ne.s32.totalorder %s794_s25, 0 }
 0x22d   : > { %p801_p1 = scmp.ge.s32.totalorder %s591_s15, 2  ;;  %s353_s8 = scalar_lea.sflag [#allocation4], %s352_s23 }
 0x22f   : > { %p446_p3 = pnand %p801_p1, %p800_p13 }
 0x231   : > { %p447_p5 = pneg %p446_p3 }
 0x233   : > { %574 = dma.done.wait (%p447_p5), %s353_s8, 256  }
 0x234   : > { %576 = vsyncadd (%p447_p5), %s353_s8, 4294967040  ;;  %p16_p8 = scmp.ge.s32.totalorder %s643_s18, 4   ;;  %s802_s12 = smov %s583_s13 }
 0x235   : > { %s803_s13 = smov %s587_s14  ;;  %s804_s14 = smov %s655_s21 }
 0x236   : > { %s805_s15 = smov %s643_s18  ;;  %18 = sbr.rel (!%p16_p8) target bundleno = 5 (0x5), region = 77 }
 0x23b   :  { %358 = vsyncpa [#allocation3], 1 }
 0x23c   :  { %360 = vsyncpa [#allocation3 + $0x1], 1 }
 0x23d   :  { %361 = vsyncpa [#allocation4], 1 }
 0x23e   :  { %363 = vsyncpa [#allocation4 + $0x1], 1 }

</bundles_post_ra>
